<compile_context>
chip_gen: v6e
topology: v6e:2x2x1
jax: 0.10.0
libtpu: 0.0.40
codegen_flags: <defaults>
</compile_context>

<pallas_src>
import functools

import jax
import jax.numpy as jnp
from jax.experimental import pallas as pl
from jax.experimental.pallas import tpu as pltpu

HIDDEN = 256


def _round_up(x, m):
    return ((x + m - 1) // m) * m


def softq_kernel(x_ref, w1_ref, b12_ref, w2_ref, w3_ref, b3_ref, out_ref):
    """x_ref: [TB, state_dim+action_dim] f32 tile; weights bf16, biases f32."""
    wdt = w1_ref.dtype
    b1 = b12_ref[0:1, :]  # [1, 256] f32
    b2 = b12_ref[1:2, :]  # [1, 256] f32

    # Layer 1: relu(x @ W1 + b1)   — single matmul over the concatenated input.
    h1 = jnp.dot(x_ref[...].astype(wdt), w1_ref[...],
                 preferred_element_type=jnp.float32) + b1
    h1 = jnp.maximum(h1, 0.0)

    # Layer 2: relu(h1 @ W2 + b2)
    h2 = jnp.dot(h1.astype(wdt), w2_ref[...],
                 preferred_element_type=jnp.float32) + b2
    h2 = jnp.maximum(h2, 0.0)

    # Layer 3: h2 @ W3 + b3  (no activation)
    out_ref[...] = (jnp.dot(h2.astype(wdt), w3_ref[...],
                            preferred_element_type=jnp.float32)
                    + b3_ref[...]).astype(out_ref.dtype)


@functools.partial(jax.jit, static_argnames=("batch_tile",))
def soft_q_forward(state, action, params, *, batch_tile=256):
    """state: [B, state_dim], action: [B, action_dim] -> q: [B, action_dim]."""
    B = state.shape[0]
    in1 = params["w1"].shape[0]          # state_dim + action_dim
    action_dim = params["w3"].shape[1]

    # Fold the concat into the wrapper (one matmul in-kernel instead of two).
    x = jnp.concatenate([state, action], axis=1).astype(jnp.float32)

    # Batch tile: multiple of 8 sublanes, capped at batch_tile (256 for
    # v6e/v7x, pass 128 for v5e).  Pad B up to a tile multiple, slice after.
    tb = min(batch_tile, _round_up(B, 8))
    b_pad = _round_up(B, tb)
    if b_pad != B:
        x = jnp.pad(x, ((0, b_pad - B), (0, 0)))
    grid = (b_pad // tb,)

    wbytes = (params["w1"].size * params["w1"].dtype.itemsize
              + params["w2"].size * params["w2"].dtype.itemsize
              + params["w3"].size * params["w3"].dtype.itemsize
              + params["b12"].size * 4 + params["b3"].size * 4)
    cost = pl.CostEstimate(
        flops=2 * b_pad * (in1 * HIDDEN + HIDDEN * HIDDEN + HIDDEN * action_dim),
        transcendentals=0,
        bytes_accessed=x.size * 4 + wbytes + b_pad * action_dim * 4,
    )

    out = pl.pallas_call(
        softq_kernel,
        out_shape=jax.ShapeDtypeStruct((b_pad, action_dim), jnp.float32),
        grid=grid,
        in_specs=[
            pl.BlockSpec((tb, in1), lambda i: (i, 0)),          # x tile
            pl.BlockSpec((in1, HIDDEN), lambda i: (0, 0)),      # W1 (resident)
            pl.BlockSpec((2, HIDDEN), lambda i: (0, 0)),        # [b1; b2]
            pl.BlockSpec((HIDDEN, HIDDEN), lambda i: (0, 0)),   # W2
            pl.BlockSpec((HIDDEN, action_dim), lambda i: (0, 0)),  # W3
            pl.BlockSpec((1, action_dim), lambda i: (0, 0)),    # b3
        ],
        out_specs=pl.BlockSpec((tb, action_dim), lambda i: (i, 0)),
        compiler_params=pltpu.CompilerParams(
            dimension_semantics=("parallel",)),
        cost_estimate=cost,
    )(x, params["w1"], params["b12"], params["w2"], params["w3"], params["b3"])

    return out[:B]


def init_params(key, state_dim, action_dim, edge=0.003,
                weight_dtype=jnp.bfloat16):
    """Mirror nn.Linear default init + the custom layer-3 uniform(-edge, edge).

    Weights stored as [in, out] (transposed vs PyTorch's [out, in]) so the
    kernel computes y = x @ W + b directly.  Weights in bf16, biases in f32.
    """
    k1w, k1b, k2w, k2b, k3w, k3b = jax.random.split(key, 6)
    in1 = state_dim + action_dim
    bound1 = 1.0 / jnp.sqrt(in1)
    bound2 = 1.0 / jnp.sqrt(HIDDEN)
    w1 = jax.random.uniform(k1w, (in1, HIDDEN), jnp.float32, -bound1, bound1)
    b1 = jax.random.uniform(k1b, (1, HIDDEN), jnp.float32, -bound1, bound1)
    w2 = jax.random.uniform(k2w, (HIDDEN, HIDDEN), jnp.float32, -bound2, bound2)
    b2 = jax.random.uniform(k2b, (1, HIDDEN), jnp.float32, -bound2, bound2)
    w3 = jax.random.uniform(k3w, (HIDDEN, action_dim), jnp.float32, -edge, edge)
    b3 = jax.random.uniform(k3b, (1, action_dim), jnp.float32, -edge, edge)
    return {
        "w1": w1.astype(weight_dtype),
        "w2": w2.astype(weight_dtype),
        "w3": w3.astype(weight_dtype),
        "b12": jnp.concatenate([b1, b2], axis=0),   # [2, 256] f32
        "b3": b3,                                   # [1, action_dim] f32
    }


def reference_forward(state, action, params):
    """Pure-JAX reference applying the same bf16 weight/operand rounding."""
    wdt = params["w1"].dtype
    x = jnp.concatenate([state, action], axis=1).astype(jnp.float32)

    def dense(h, w):
        return jnp.dot(h.astype(wdt).astype(jnp.float32),
                       w.astype(jnp.float32),
                       preferred_element_type=jnp.float32)

    h1 = jax.nn.relu(dense(x, params["w1"]) + params["b12"][0:1])
    h2 = jax.nn.relu(dense(h1, params["w2"]) + params["b12"][1:2])
    return dense(h2, params["w3"]) + params["b3"]


if __name__ == "__main__":
    STATE_DIM, ACTION_DIM = 24, 8
    key = jax.random.PRNGKey(0)
    kp, ks, ka = jax.random.split(key, 3)
    params = init_params(kp, STATE_DIM, ACTION_DIM)

    # Small batch (single grid step).
    B = 8
    state = jax.random.normal(ks, (B, STATE_DIM), jnp.float32)
    action = jax.random.normal(ka, (B, ACTION_DIM), jnp.float32)
    q = jax.block_until_ready(soft_q_forward(state, action, params))
    q_ref = reference_forward(state, action, params)
    assert q.shape == (B, ACTION_DIM)
    assert jnp.allclose(q, q_ref, atol=1e-3, rtol=1e-3), \
        float(jnp.max(jnp.abs(q - q_ref)))

    # Larger, non-tile-multiple batch: exercises the grid + padding path.
    B2 = 300
    ks2, ka2 = jax.random.split(jax.random.PRNGKey(1))
    state2 = jax.random.normal(ks2, (B2, STATE_DIM), jnp.float32)
    action2 = jax.random.normal(ka2, (B2, ACTION_DIM), jnp.float32)
    q2 = jax.block_until_ready(soft_q_forward(state2, action2, params))
    q2_ref = reference_forward(state2, action2, params)
    assert q2.shape == (B2, ACTION_DIM)
    assert jnp.allclose(q2, q2_ref, atol=1e-3, rtol=1e-3), \
        float(jnp.max(jnp.abs(q2 - q2_ref)))

    print("KERNEL_OK")
</pallas_src>

<mosaic_0001>
module attributes {stable_mosaic.version = 11 : i64} {
  func.func @softq_kernel(%arg0: i32, %arg1: memref<8x32xf32, #tpu.memory_space<vmem>>, %arg2: memref<32x256xbf16, #tpu.memory_space<vmem>>, %arg3: memref<2x256xf32, #tpu.memory_space<vmem>>, %arg4: memref<256x256xbf16, #tpu.memory_space<vmem>>, %arg5: memref<256x8xbf16, #tpu.memory_space<vmem>>, %arg6: memref<1x8xf32, #tpu.memory_space<vmem>>, %arg7: memref<8x8xf32, #tpu.memory_space<vmem>>) attributes {dimension_semantics = [#tpu.dimension_semantics<parallel>], iteration_bounds = array<i64: 1>, scalar_prefetch = 0 : i64, scratch_operands = 0 : i64, tpu.core_type = #tpu.core_type<tc>, window_params = [{transform_indices = @transform_0, window_bounds = array<i64: 8, 32>}, {pipeline_mode = #tpu.pipeline_mode<synchronous>, transform_indices = @transform_1, window_bounds = array<i64: 32, 256>}, {pipeline_mode = #tpu.pipeline_mode<synchronous>, transform_indices = @transform_2, window_bounds = array<i64: 2, 256>}, {pipeline_mode = #tpu.pipeline_mode<synchronous>, transform_indices = @transform_3, window_bounds = array<i64: 256, 256>}, {pipeline_mode = #tpu.pipeline_mode<synchronous>, transform_indices = @transform_4, window_bounds = array<i64: 256, 8>}, {pipeline_mode = #tpu.pipeline_mode<synchronous>, transform_indices = @transform_5, window_bounds = array<i64: 1, 8>}, {transform_indices = @transform_6, window_bounds = array<i64: 8, 8>}]} {
    %c0 = arith.constant 0 : index
    %c0_0 = arith.constant 0 : index
    %0 = vector.load %arg3[%c0, %c0_0] : memref<2x256xf32, #tpu.memory_space<vmem>>, vector<1x256xf32>
    %c1 = arith.constant 1 : index
    %c0_1 = arith.constant 0 : index
    %1 = vector.load %arg3[%c1, %c0_1] : memref<2x256xf32, #tpu.memory_space<vmem>>, vector<1x256xf32>
    %c0_2 = arith.constant 0 : index
    %c0_3 = arith.constant 0 : index
    %2 = vector.load %arg1[%c0_2, %c0_3] : memref<8x32xf32, #tpu.memory_space<vmem>>, vector<8x32xf32>
    %3 = arith.truncf %2 : vector<8x32xf32> to vector<8x32xbf16>
    %c0_4 = arith.constant 0 : index
    %c0_5 = arith.constant 0 : index
    %4 = vector.load %arg2[%c0_4, %c0_5] : memref<32x256xbf16, #tpu.memory_space<vmem>>, vector<32x256xbf16>
    %cst = arith.constant dense<0.000000e+00> : vector<8x256xf32>
    %5 = tpu.matmul %3, %4, %cst {dimension_numbers = #tpu.dot_dimension_numbers<[1], [0], [0], [1], [0, 0, 1, 1], [], []>} : vector<8x32xbf16>, vector<32x256xbf16>, vector<8x256xf32> -> vector<8x256xf32>
    %6 = vector.broadcast %0 : vector<1x256xf32> to vector<8x256xf32>
    %7 = arith.addf %5, %6 : vector<8x256xf32>
    %cst_6 = arith.constant 0.000000e+00 : f32
    %8 = vector.broadcast %cst_6 : f32 to vector<8x256xf32>
    %9 = arith.maximumf %7, %8 : vector<8x256xf32>
    %10 = arith.truncf %9 : vector<8x256xf32> to vector<8x256xbf16>
    %c0_7 = arith.constant 0 : index
    %c0_8 = arith.constant 0 : index
    %11 = vector.load %arg4[%c0_7, %c0_8] : memref<256x256xbf16, #tpu.memory_space<vmem>>, vector<256x256xbf16>
    %cst_9 = arith.constant dense<0.000000e+00> : vector<8x256xf32>
    %12 = tpu.matmul %10, %11, %cst_9 {dimension_numbers = #tpu.dot_dimension_numbers<[1], [0], [0], [1], [0, 0, 1, 1], [], []>} : vector<8x256xbf16>, vector<256x256xbf16>, vector<8x256xf32> -> vector<8x256xf32>
    %13 = vector.broadcast %1 : vector<1x256xf32> to vector<8x256xf32>
    %14 = arith.addf %12, %13 : vector<8x256xf32>
    %cst_10 = arith.constant 0.000000e+00 : f32
    %15 = vector.broadcast %cst_10 : f32 to vector<8x256xf32>
    %16 = arith.maximumf %14, %15 : vector<8x256xf32>
    %17 = arith.truncf %16 : vector<8x256xf32> to vector<8x256xbf16>
    %c0_11 = arith.constant 0 : index
    %c0_12 = arith.constant 0 : index
    %18 = vector.load %arg5[%c0_11, %c0_12] : memref<256x8xbf16, #tpu.memory_space<vmem>>, vector<256x8xbf16>
    %cst_13 = arith.constant dense<0.000000e+00> : vector<8x8xf32>
    %19 = tpu.matmul %17, %18, %cst_13 {dimension_numbers = #tpu.dot_dimension_numbers<[1], [0], [0], [1], [0, 0, 1, 1], [], []>} : vector<8x256xbf16>, vector<256x8xbf16>, vector<8x8xf32> -> vector<8x8xf32>
    %c0_14 = arith.constant 0 : index
    %c0_15 = arith.constant 0 : index
    %20 = vector.load %arg6[%c0_14, %c0_15] : memref<1x8xf32, #tpu.memory_space<vmem>>, vector<1x8xf32>
    %21 = vector.broadcast %20 : vector<1x8xf32> to vector<8x8xf32>
    %22 = arith.addf %19, %21 : vector<8x8xf32>
    %c0_16 = arith.constant 0 : index
    %c0_17 = arith.constant 0 : index
    %23 = vector.load %arg7[%c0_16, %c0_17] : memref<8x8xf32, #tpu.memory_space<vmem>>, vector<8x8xf32>
    tpu.vector_store %arg7[%c0_16, %c0_17], %22 {strides = array<i32>} : memref<8x8xf32, #tpu.memory_space<vmem>>, vector<8x8xf32>,
    return
  }
  func.func @transform_0(%arg0: i32) -> (i32, i32) {
    %c0_i32 = arith.constant 0 : i32
    %c0_i32_0 = arith.constant 0 : i32
    return %arg0, %c0_i32 : i32, i32
  }
  func.func @transform_1(%arg0: i32) -> (i32, i32) {
    %c0_i32 = arith.constant 0 : i32
    %c0_i32_0 = arith.constant 0 : i32
    %c0_i32_1 = arith.constant 0 : i32
    return %c0_i32, %c0_i32_0 : i32, i32
  }
  func.func @transform_2(%arg0: i32) -> (i32, i32) {
    %c0_i32 = arith.constant 0 : i32
    %c0_i32_0 = arith.constant 0 : i32
    %c0_i32_1 = arith.constant 0 : i32
    return %c0_i32, %c0_i32_0 : i32, i32
  }
  func.func @transform_3(%arg0: i32) -> (i32, i32) {
    %c0_i32 = arith.constant 0 : i32
    %c0_i32_0 = arith.constant 0 : i32
    %c0_i32_1 = arith.constant 0 : i32
    return %c0_i32, %c0_i32_0 : i32, i32
  }
  func.func @transform_4(%arg0: i32) -> (i32, i32) {
    %c0_i32 = arith.constant 0 : i32
    %c0_i32_0 = arith.constant 0 : i32
    %c0_i32_1 = arith.constant 0 : i32
    return %c0_i32, %c0_i32_0 : i32, i32
  }
  func.func @transform_5(%arg0: i32) -> (i32, i32) {
    %c0_i32 = arith.constant 0 : i32
    %c0_i32_0 = arith.constant 0 : i32
    %c0_i32_1 = arith.constant 0 : i32
    return %c0_i32, %c0_i32_0 : i32, i32
  }
  func.func @transform_6(%arg0: i32) -> (i32, i32) {
    %c0_i32 = arith.constant 0 : i32
    %c0_i32_0 = arith.constant 0 : i32
    return %arg0, %c0_i32 : i32, i32
  }
}

</mosaic_0001>

<bundles_post_ra>
// kernel: soft_q_forward.1
= control target key start
LH: loop header
LB: loop body
LE: loop exit
PB: predicated region body
PF: predicated region fallthrough
CT: control target
= control target key end

     0   :  { %11 = vsyncpa [#allocation3], 0  ;;  %s882_s0 = inlined_call_operand.vmem [shape: f32[8,32], index: 0, kind: input, shape index: {}]   ;;  %s883_s1 = inlined_call_operand.vmem [shape: bf16[32,256], index: 1, kind: input, shape index: {}]   ;;  %s884_s2 = inlined_call_operand.vmem [shape: f32[2,256], index: 2, kind: input, shape index: {}]   ;;  %s885_s3 = inlined_call_operand.hbm [shape: bf16[256,256], index: 3, kind: input, shape index: {}]   ;;  %s886_s4 = inlined_call_operand.vmem [shape: bf16[256,8], index: 4, kind: input, shape index: {}]   ;;  %s887_s5 = inlined_call_operand.vmem [shape: f32[1,8], index: 5, kind: input, shape index: {}]   ;;  %s888_s6 = inlined_call_operand.hbm [shape: f32[8,8], index: 6, kind: output, shape index: {}]  }
   0x1   :  { %12 = vsyncpa [#allocation4], 0  ;;  %s764_s21 = smov [#allocation2]  }
   0x2   :  { %s24_s22 = sshll.u32 %s764_s21, 4  ;;  %s25_s22 = int_to_ptr.vmem [resolvable:$true] %s24_s22 }
   0x3   :  { %s728_s23 = scalar_lea.vmem %s25_s22, 4096  ;;  %p733_p1 = scmp.lt.s32.totalorder %s25_s22, %s25_s22 }
   0x4   :  { %p729_p0 = scmp.ne.s32.totalorder %s25_s22, %s728_s23  ;;  %p734_p2 = scmp.lt.s32.totalorder %s728_s23, %s728_s23 }
   0x6   :  { %p735_p3 = por %p734_p2, %p733_p1 }
   0x8   :  { %p736_p4 = pnand %p735_p3, %p729_p0 }
   0xa   :  { %739 = shalt.err (!%p736_p4)
}
   0xb   :  { %s765_s24 = smov 128   ;;  %s766_s25 = smov 8  }
   0xc   :  { %30 = dma.hbm_to_vmem [thread:$0]  %s885_s3, 4096, %s25_s22, [#allocation3], %s765_s24, %s765_s24, %s766_s25  }
   0xd   :  { %760 = dma.done.wait [#allocation3], 4096  }
   0xe   :  { %761 = vsyncadd [#allocation3], 4294963200  ;;  %v767_v0 = vmov 0   ;;  %v650_v1 = vld [vmem:[%s883_s1 + $0x14] ss:$8 sps:$4 sm:$0xff]   ;;  %v42_v5 = vld [vmem:[%s882_s0] sm:$0xff]  ;;  %v49_v51 = vlaneseq }
   0xf   :  { %115 = vmatprep.mubr.bf16.mxu0 %v767_v0  ;;  %v652_v2 = vld [vmem:[%s883_s1 + $0x10] ss:$8 sps:$4 sm:$0xff]   ;;  %95 = vmatprep.subr.bf16.mxu0 %v650_v1  ;;  %v653_v3 = vld [vmem:[%s883_s1 + $0x4] ss:$8 sps:$4 sm:$0xff]   ;;  %v655_v4 = vld [vmem:[%s883_s1] ss:$8 sps:$4 sm:$0xff]   ;;  %v43_v9 = vpack.c.bf16 %v42_v5, %v42_v5 }
  0x10   :  { %96 = vmatpush1.bf16.msra.mxu0 %v652_v2  ;;  %v656_v6 = vld [vmem:[#allocation2 + $0x74] ss:$8 sps:$4 sm:$0xff]   ;;  %v658_v7 = vld [vmem:[#allocation2 + $0x70] ss:$8 sps:$4 sm:$0xff]   ;;  %v659_v8 = vld [vmem:[#allocation2 + $0x64] ss:$8 sps:$4 sm:$0xff]  }
  0x11   :  { %97 = vmatprep.subr.bf16.mxu0 %v653_v3  ;;  %331 = vmatprep.subr.bf16.mxu1 %v656_v6  ;;  %v661_v10 = vld [vmem:[#allocation2 + $0x60] ss:$8 sps:$4 sm:$0xff]   ;;  %vm79_vm0 = vcmask 261120   ;;  %v662_v11 = vld [vmem:[#allocation2 + $0x54] ss:$8 sps:$4 sm:$0xff]   ;;  %v50_v52 = vshrl.u32 %v49_v51, 7 }
  0x12   :  { %332 = vmatpush1.bf16.msra.mxu1 %v658_v7  ;;  %v664_v12 = vld [vmem:[#allocation2 + $0x50] ss:$8 sps:$4 sm:$0xff]   ;;  %v665_v13 = vld [vmem:[#allocation2 + $0x44] ss:$8 sps:$4 sm:$0xff]   ;;  %v667_v14 = vld [vmem:[#allocation2 + $0x40] ss:$8 sps:$4 sm:$0xff]  }
  0x13   :  { %333 = vmatprep.subr.bf16.mxu1 %v659_v8  ;;  %v668_v15 = vld [vmem:[#allocation2 + $0x34] ss:$8 sps:$4 sm:$0xff]   ;;  %v670_v16 = vld [vmem:[#allocation2 + $0x30] ss:$8 sps:$4 sm:$0xff]   ;;  %v671_v17 = vld [vmem:[#allocation2 + $0x24] ss:$8 sps:$4 sm:$0xff]  }
  0x14   :  { %98 = vmatpush1.bf16.msra.mxu0 %v655_v4  ;;  %v673_v18 = vld [vmem:[#allocation2 + $0x20] ss:$8 sps:$4 sm:$0xff]   ;;  %v674_v19 = vld [vmem:[#allocation2 + $0x14] ss:$8 sps:$4 sm:$0xff]   ;;  %v676_v20 = vld [vmem:[#allocation2 + $0x10] ss:$8 sps:$4 sm:$0xff]  }
  0x15   :  { %v677_v21 = vld [vmem:[#allocation2 + $0x4] ss:$8 sps:$4 sm:$0xff]   ;;  %v679_v22 = vld [vmem:[#allocation2] ss:$8 sps:$4 sm:$0xff]   ;;  %v680_v23 = vld [vmem:[#allocation2 + $0xf4] ss:$8 sps:$4 sm:$0xff]  }
  0x16   :  { %334 = vmatpush1.bf16.msra.mxu1 %v661_v10  ;;  %v682_v24 = vld [vmem:[#allocation2 + $0xf0] ss:$8 sps:$4 sm:$0xff]   ;;  %v683_v25 = vld [vmem:[#allocation2 + $0xe4] ss:$8 sps:$4 sm:$0xff]   ;;  %v685_v26 = vld [vmem:[#allocation2 + $0xe0] ss:$8 sps:$4 sm:$0xff]  }
  0x17   :  { %573 = vmatmul.mubr.msk.bf16.vlgmr.msra.gmra.mxu0 %vm79_vm0, %v43_v9  ;;  %335 = vmatprep.subr.bf16.mxu1 %v662_v11  ;;  %v686_v27 = vld [vmem:[#allocation2 + $0xd4] ss:$8 sps:$4 sm:$0xff]   ;;  %v688_v28 = vld [vmem:[#allocation2 + $0xd0] ss:$8 sps:$4 sm:$0xff]   ;;  %v689_v29 = vld [vmem:[#allocation2 + $0xc4] ss:$8 sps:$4 sm:$0xff]  }
  0x18   :  { %v691_v30 = vld [vmem:[#allocation2 + $0xc0] ss:$8 sps:$4 sm:$0xff]   ;;  %v692_v31 = vld [vmem:[#allocation2 + $0xb4] ss:$8 sps:$4 sm:$0xff]   ;;  %v694_v32 = vld [vmem:[#allocation2 + $0xb0] ss:$8 sps:$4 sm:$0xff]  }
  0x19   :  { %v695_v33 = vld [vmem:[#allocation2 + $0xa4] ss:$8 sps:$4 sm:$0xff]   ;;  %v697_v34 = vld [vmem:[#allocation2 + $0xa0] ss:$8 sps:$4 sm:$0xff]   ;;  %v698_v35 = vld [vmem:[#allocation2 + $0x94] ss:$8 sps:$4 sm:$0xff]  }
  0x1a   :  { %336 = vmatpush1.bf16.msra.mxu1 %v664_v12  ;;  %v700_v36 = vld [vmem:[#allocation2 + $0x90] ss:$8 sps:$4 sm:$0xff]   ;;  %v701_v37 = vld [vmem:[#allocation2 + $0x84] ss:$8 sps:$4 sm:$0xff]   ;;  %v703_v38 = vld [vmem:[#allocation2 + $0x80] ss:$8 sps:$4 sm:$0xff]  }
  0x1b   :  { %337 = vmatprep.subr.bf16.mxu1 %v665_v13  ;;  %v704_v39 = vld [vmem:[%s886_s4 + $0x78] sm:$0xff]   ;;  %v706_v41 = vld [vmem:[%s886_s4 + $0x70] sm:$0xff]   ;;  %v708_v43 = vld [vmem:[%s886_s4 + $0x68] sm:$0xff]   ;;  %v51_v53 = vsub.s32 0, %v50_v52  ;;  %v55_v55 = vsub.s32 1, %v50_v52  ;;  %vm551_vm1 = vcmask 64512  }
  0x1c   :  { %v705_v40 = vld [vmem:[%s886_s4 + $0x38] sm:$0xff]   ;;  %623 = vmatprep.subr.bf16.mxu0 %v704_v39  ;;  %v707_v42 = vld [vmem:[%s886_s4 + $0x30] sm:$0xff]   ;;  %v709_v44 = vld [vmem:[%s886_s4 + $0x28] sm:$0xff]  }
  0x1d   :  { %624 = vmatpush3.bf16.msra.mxu0 %v705_v40  ;;  %v710_v45 = vld [vmem:[%s886_s4 + $0x60] sm:$0xff]   ;;  %v712_v47 = vld [vmem:[%s886_s4 + $0x58] sm:$0xff]   ;;  %v714_v49 = vld [vmem:[%s886_s4 + $0x50] sm:$0xff]  }
  0x1e   :  { %338 = vmatpush1.bf16.msra.mxu1 %v667_v14  ;;  %625 = vmatprep.subr.bf16.mxu0 %v706_v41  ;;  %v711_v46 = vld [vmem:[%s886_s4 + $0x20] sm:$0xff]   ;;  %v713_v48 = vld [vmem:[%s886_s4 + $0x18] sm:$0xff]   ;;  %v715_v50 = vld [vmem:[%s886_s4 + $0x10] sm:$0xff]  }
  0x1f   :  { %339 = vmatprep.subr.bf16.mxu1 %v668_v15  ;;  %v39_v54 = vld [vmem:[%s884_s2] ss:$2 sm:$0x3]  ;;  %v716_v4 = vld [vmem:[%s886_s4 + $0x48] sm:$0xff]  }
  0x20   :  { %v52_v56 = vrot.slane %v39_v54, %v51_v53  ;;  %v56_v57 = vrot.slane %v39_v54, %v55_v55  ;;  %v717_v5 = vld [vmem:[%s886_s4 + $0x8] sm:$0xff]   ;;  %v718_v6 = vld [vmem:[%s886_s4 + $0x40] sm:$0xff]  }
  0x21   :  { %626 = vmatpush3.bf16.msra.mxu0 %v707_v42  ;;  %v719_v7 = vld [vmem:[%s886_s4] sm:$0xff]  }
  0x22   :  { %340 = vmatpush1.bf16.msra.mxu1 %v670_v16  ;;  %627 = vmatprep.subr.bf16.mxu0 %v708_v43  ;;  %v568_v8 = vld [vmem:[%s884_s2 + $0x1] ss:$2 sm:$0x3]  ;;  %s768_s2 = smov [#allocation5]  }
  0x23   :  { %341 = vmatprep.subr.bf16.mxu1 %v671_v17  ;;  %v164_v9 = vrot.slane %v568_v8, %v51_v53  ;;  %v168_v10 = vrot.slane %v568_v8, %v55_v55  ;;  %s559_s21 = sshll.u32 %s768_s2, 4  ;;  %s560_s21 = int_to_ptr.vmem [resolvable:$true] %s559_s21 }
  0x24   :  { %s740_s22 = scalar_lea.vmem %s560_s21, 128  ;;  %p745_p6 = scmp.lt.s32.totalorder %s560_s21, %s560_s21 }
  0x25   :  { %628 = vmatpush3.bf16.msra.mxu0 %v709_v44  ;;  %p741_p5 = scmp.ne.s32.totalorder %s560_s21, %s740_s22  ;;  %p746_p7 = scmp.lt.s32.totalorder %s740_s22, %s740_s22 }
  0x26   :  { %342 = vmatpush1.bf16.msra.mxu1 %v673_v18  ;;  %629 = vmatprep.subr.bf16.mxu0 %v710_v45 }
  0x27   :  { %343 = vmatprep.subr.bf16.mxu1 %v674_v19  ;;  %p747_p8 = por %p746_p7, %p745_p6 }
  0x29   :  { %630 = vmatpush3.bf16.msra.mxu0 %v711_v46  ;;  %p748_p9 = pnand %p747_p8, %p741_p5 }
  0x2a   :  { %344 = vmatpush1.bf16.msra.mxu1 %v676_v20  ;;  %631 = vmatprep.subr.bf16.mxu0 %v712_v47 }
  0x2b   :  { %345 = vmatprep.subr.bf16.mxu1 %v677_v21 }
  0x2d   :  { %632 = vmatpush3.bf16.msra.mxu0 %v713_v48 }
  0x2e   :  { %346 = vmatpush1.bf16.msra.mxu1 %v679_v22  ;;  %633 = vmatprep.subr.bf16.mxu0 %v714_v49  ;;  %v606_v22 = vld [vmem:[%s887_s5] ss:$0 sm:$0xff] }
  0x2f   :  { %347 = vmatprep.subr.bf16.mxu1 %v680_v23 }
  0x31   :  { %634 = vmatpush3.bf16.msra.mxu0 %v715_v50 }
  0x32   :  { %348 = vmatpush2.bf16.msra.mxu1 %v682_v24  ;;  %635 = vmatprep.subr.bf16.mxu0 %v716_v4 }
  0x33   :  { %349 = vmatprep.subr.bf16.mxu1 %v683_v25 }
  0x35   :  { %636 = vmatpush3.bf16.msra.mxu0 %v717_v5 }
  0x36   :  { %350 = vmatpush2.bf16.msra.mxu1 %v685_v26  ;;  %637 = vmatprep.subr.bf16.mxu0 %v718_v6 }
  0x37   :  { %351 = vmatprep.subr.bf16.mxu1 %v686_v27 }
  0x39   :  { %638 = vmatpush3.bf16.msra.mxu0 %v719_v7 }
  0x3a   :  { %352 = vmatpush2.bf16.msra.mxu1 %v688_v28 }
  0x3b   :  { %353 = vmatprep.subr.bf16.mxu1 %v689_v29 }
  0x3e   :  { %354 = vmatpush2.bf16.msra.mxu1 %v691_v30 }
  0x3f   :  { %355 = vmatprep.subr.bf16.mxu1 %v692_v31 }
  0x42   :  { %356 = vmatpush2.bf16.msra.mxu1 %v694_v32 }
  0x43   :  { %357 = vmatprep.subr.bf16.mxu1 %v695_v33 }
  0x46   :  { %358 = vmatpush2.bf16.msra.mxu1 %v697_v34 }
  0x47   :  { %359 = vmatprep.subr.bf16.mxu1 %v698_v35 }
  0x4a   :  { %360 = vmatpush2.bf16.msra.mxu1 %v700_v36 }
  0x4b   :  { %361 = vmatprep.subr.bf16.mxu1 %v701_v37 }
  0x4e   :  { %362 = vmatpush2.bf16.msra.mxu1 %v703_v38 }
  0xd7   :  { %v117_v58 = vpop.f32.mrf.mxu0 }
  0xd8   :  { %v118_v59 = vadd.f32 %v117_v58, %v52_v56 }
  0xd9   :  { %v119_v60 = vpop.f32.mrf.mxu0 }
  0xda   :  { %v120_v61 = vadd.f32 %v119_v60, %v56_v57  ;;  %v124_v62 = vmax.f32 %v118_v59, 0.0 }
  0xdb   :  { %v121_v63 = vpop.f32.mrf.mxu0 }
  0xdc   :  { %v125_v0 = vmax.f32 %v120_v61, 0.0  ;;  %v126_v3 = vpack.c.bf16 %v124_v62, %v124_v62 }
  0xdd   :  { %v122_v1 = vpop.f32.mrf.mxu0 }
  0xde   :  { %v127_v2 = vpack.c.bf16 %v125_v0, %v125_v0 }
  0xe0   :  { %363 = vmatprep.mubr.bf16.mxu1 %v127_v2 }
  0xe1   :  { %364 = vmatmul.mubr.bf16.vlgmr.msra.gmra.mxu1 %v126_v3 }
 0x1a1   :  { %v365_v11 = vpop.f32.mrf.mxu1 }
 0x1a2   :  { %v366_v12 = vadd.f32 %v365_v11, %v164_v9 }
 0x1a3   :  { %v367_v13 = vpop.f32.mrf.mxu1 }
 0x1a4   :  { %v368_v14 = vadd.f32 %v367_v13, %v168_v10  ;;  %v372_v15 = vmax.f32 %v366_v12, 0.0 }
 0x1a5   :  { %v369_v16 = vpop.f32.mrf.mxu1 }
 0x1a6   :  { %v373_v17 = vmax.f32 %v368_v14, 0.0  ;;  %v374_v20 = vpack.c.bf16 %v372_v15, %v372_v15 }
 0x1a7   :  { %v370_v18 = vpop.f32.mrf.mxu1 }
 0x1a8   :  { %v375_v19 = vpack.c.bf16 %v373_v17, %v373_v17 }
 0x1aa   :  { %543 = vmatprep.mubr.bf16.mxu0 %v375_v19 }
 0x1ab   :  { %544 = vmatmul.mubr.bf16.vlgmr.msra.gmra.mxu0 %v374_v20 }
 0x26b   :  { %v639_v21 = vpop.f32.mrf.mxu0 }
 0x26d   :  { %v640_v23 = vpop.f32.mrf.mxu0 }
 0x26e   :  { %v641_v24 = vadd.f32 %v640_v23, %v639_v21 }
 0x26f   :  { %v642_v25 = vpop.f32.mrf.mxu0 }
 0x270   :  { %v546_v26 = vadd.f32 %v641_v24, %v606_v22 }
 0x271   :  { %v643_v27 = vpop.f32.mrf.mxu0 }
 0x272   :  { %552 = vst.msk [vmem:[#allocation5] sm:$0xff] %vm551_vm1, %v546_v26 }
 0x273   :  { %751 = shalt.err (!%p748_p9)
}
 0x274   :  { %562 = dma.vmem_to_hbm [thread:$0]  %s560_s21, 128, %s888_s6, [#allocation4]  }
 0x275   :  { %762 = dma.done.wait [#allocation4], 128  }
 0x276   :  { %763 = vsyncadd [#allocation4], 4294967168 }
 0x277   :  { %566 = vsyncpa [#allocation3], 1 }
 0x278   :  { %567 = vsyncpa [#allocation4], 1 }

</bundles_post_ra>
